<compile_context>
chip_gen: v7x
topology: tpu7x:2x2x1
jax: 0.10.0
libtpu: 0.0.40
codegen_flags: <defaults>
</compile_context>

<pallas_src>
import math
import functools

import jax
import jax.numpy as jnp
from jax.experimental import pallas as pl
from jax.experimental.pallas import tpu as pltpu


def _embed_gather_kernel(ids_ref, table_hbm, out_ref, rows, sems, *,
                         token_tile, scale):
    # ids_ref   : SMEM (n_padded,)            int32   (scalar prefetch)
    # table_hbm : HBM  (vocab, d_model)       float32 (memory_space=pl.ANY, no auto-DMA)
    # out_ref   : VMEM (token_tile, d_model)  float32 (pipelined output block)
    # rows      : VMEM (token_tile, d_model)  float32 scratch (gather landing buffer)
    # sems      : DMA semaphores, one per in-flight row copy
    base = pl.program_id(0) * token_tile

    # Issue every row gather for this tile; all copies are in flight concurrently,
    # so DMA latency overlaps the (scalar) issue loop itself.
    @pl.loop(0, token_tile)
    def _issue(t):
        row = ids_ref[base + t]
        pltpu.make_async_copy(
            table_hbm.at[pl.ds(row, 1), :],
            rows.at[pl.ds(t, 1), :],
            sems.at[t],
        ).start()

    # Wait for every row copy of this tile.
    @pl.loop(0, token_tile)
    def _wait(t):
        pltpu.make_async_copy(
            table_hbm.at[pl.ds(0, 1), :],
            rows.at[pl.ds(t, 1), :],
            sems.at[t],
        ).wait()

    # sqrt(d_model) scale fused with the single lane-dense store of the slab.
    out_ref[...] = rows[...] * jnp.asarray(scale, dtype=rows.dtype)


def embeddings_forward(x, table, *, token_tile=128):
    """Pallas equivalent of Embeddings.forward: lut(x) * sqrt(d_model)."""
    vocab, d_model = table.shape
    orig_shape = x.shape

    ids = x.reshape(-1).astype(jnp.int32)          # (N,)
    n = ids.shape[0]
    num_tiles = pl.cdiv(n, token_tile)
    n_pad = num_tiles * token_tile
    if n_pad != n:
        # Pad with id 0 (a valid row); padded outputs are sliced off below.
        ids = jnp.pad(ids, (0, n_pad - n))

    kernel = functools.partial(
        _embed_gather_kernel,
        token_tile=token_tile,
        scale=float(math.sqrt(d_model)),
    )

    out_flat = pl.pallas_call(
        kernel,
        out_shape=jax.ShapeDtypeStruct((n_pad, d_model), table.dtype),
        grid_spec=pltpu.PrefetchScalarGridSpec(
            num_scalar_prefetch=1,                        # ids -> SMEM
            grid=(num_tiles,),
            in_specs=[
                pl.BlockSpec(memory_space=pl.ANY),        # table stays in HBM
            ],
            out_specs=pl.BlockSpec((token_tile, d_model),
                                   lambda i, ids: (i, 0)),
            scratch_shapes=[
                pltpu.VMEM((token_tile, d_model), table.dtype),
                pltpu.SemaphoreType.DMA((token_tile,)),
            ],
        ),
        compiler_params=pltpu.CompilerParams(
            # Steps are fully independent -> shard token tiles across TensorCores.
            dimension_semantics=("parallel",),
        ),
    )(ids, table)

    out_flat = out_flat[:n]
    return out_flat.reshape(*orig_shape, d_model)


if __name__ == "__main__":
    key = jax.random.PRNGKey(0)
    k_tab, k_idx = jax.random.split(key)

    d_model = 32
    vocab = 32
    batch, seq = 2, 8

    # nn.Embedding default init: N(0, 1)
    table = jax.random.normal(k_tab, (vocab, d_model), dtype=jnp.float32)
    x = jax.random.randint(k_idx, (batch, seq), 0, vocab, dtype=jnp.int32)

    out = embeddings_forward(x, table)
    out = jax.block_until_ready(out)

    # reference: plain-JAX embedding lookup * sqrt(d_model)
    ref = table[x] * jnp.float32(math.sqrt(d_model))
    assert out.shape == (batch, seq, d_model)
    assert jnp.allclose(out, ref, atol=1e-5, rtol=1e-5)

    print("KERNEL_OK")
</pallas_src>

<mosaic_0001>
module attributes {stable_mosaic.version = 11 : i64} {
  func.func @_embed_gather_kernel(%arg0: i32, %arg1: memref<128xi32, #tpu.memory_space<smem>>, %arg2: memref<32x32xf32, #tpu.memory_space<any>>, %arg3: memref<128x32xf32, #tpu.memory_space<vmem>>, %arg4: memref<128x32xf32, #tpu.memory_space<vmem>>, %arg5: memref<128x!tpu.dma_semaphore, #tpu.memory_space<semaphore_mem>>) attributes {dimension_semantics = [#tpu.dimension_semantics<parallel>], iteration_bounds = array<i64: 1>, scalar_prefetch = 1 : i64, scratch_operands = 2 : i64, tpu.core_type = #tpu.core_type<tc>, window_params = [{}, {transform_indices = @transform_1, window_bounds = array<i64: 128, 32>}]} {
    %c128_i32 = arith.constant 128 : i32
    %0 = arith.muli %arg0, %c128_i32 : i32
    %c0_i32 = arith.constant 0 : i32
    %c128_i32_0 = arith.constant 128 : i32
    %1 = arith.addi %c0_i32, %c128_i32_0 : i32
    %c1_i32 = arith.constant 1 : i32
    scf.for %arg6 = %c0_i32 to %1 step %c1_i32  : i32 {
      %c1_i32_9 = arith.constant 1 : i32
      %7 = arith.muli %arg6, %c1_i32_9 : i32
      %c0_i32_10 = arith.constant 0 : i32
      %8 = arith.addi %c0_i32_10, %7 : i32
      %9 = arith.addi %0, %8 : i32
      %10 = arith.index_cast %9 : i32 to index
      %11 = memref.load %arg1[%10] : memref<128xi32, #tpu.memory_space<smem>>
      %c0_i32_11 = arith.constant 0 : i32
      %12 = tpu.memref_slice %arg2[%11, %c0_i32_11] : memref<32x32xf32, #tpu.memory_space<any>> -> memref<1x32xf32, #tpu.memory_space<any>>
      %c0_i32_12 = arith.constant 0 : i32
      %13 = tpu.memref_slice %arg4[%8, %c0_i32_12] : memref<128x32xf32, #tpu.memory_space<vmem>> -> memref<1x32xf32, #tpu.memory_space<vmem>>
      %14 = tpu.memref_slice %arg5[%8] : memref<128x!tpu.dma_semaphore, #tpu.memory_space<semaphore_mem>> -> memref<1x!tpu.dma_semaphore, #tpu.memory_space<semaphore_mem>>
      %15 = tpu.memref_squeeze %14 : memref<1x!tpu.dma_semaphore, #tpu.memory_space<semaphore_mem>> -> memref<!tpu.dma_semaphore, #tpu.memory_space<semaphore_mem>>
      tpu.enqueue_dma source(%12 : memref<1x32xf32, #tpu.memory_space<any>>) target(%13 : memref<1x32xf32, #tpu.memory_space<vmem>>) target_semaphore(%15 : memref<!tpu.dma_semaphore, #tpu.memory_space<semaphore_mem>>)
    }
    %c128_i32_1 = arith.constant 128 : i32
    %c0_i32_2 = arith.constant 0 : i32
    %c128_i32_3 = arith.constant 128 : i32
    %2 = arith.addi %c0_i32_2, %c128_i32_3 : i32
    %c1_i32_4 = arith.constant 1 : i32
    scf.for %arg6 = %c0_i32_2 to %2 step %c1_i32_4  : i32 {
      %c1_i32_9 = arith.constant 1 : i32
      %7 = arith.muli %arg6, %c1_i32_9 : i32
      %c0_i32_10 = arith.constant 0 : i32
      %8 = arith.addi %c0_i32_10, %7 : i32
      %c0_i32_11 = arith.constant 0 : i32
      %c0_i32_12 = arith.constant 0 : i32
      %9 = tpu.memref_slice %arg2[%c0_i32_11, %c0_i32_12] : memref<32x32xf32, #tpu.memory_space<any>> -> memref<1x32xf32, #tpu.memory_space<any>>
      %c0_i32_13 = arith.constant 0 : i32
      %10 = tpu.memref_slice %arg4[%8, %c0_i32_13] : memref<128x32xf32, #tpu.memory_space<vmem>> -> memref<1x32xf32, #tpu.memory_space<vmem>>
      %11 = tpu.memref_slice %arg5[%8] : memref<128x!tpu.dma_semaphore, #tpu.memory_space<semaphore_mem>> -> memref<1x!tpu.dma_semaphore, #tpu.memory_space<semaphore_mem>>
      %12 = tpu.memref_squeeze %11 : memref<1x!tpu.dma_semaphore, #tpu.memory_space<semaphore_mem>> -> memref<!tpu.dma_semaphore, #tpu.memory_space<semaphore_mem>>
      tpu.wait_dma2 semaphore(%12 : memref<!tpu.dma_semaphore, #tpu.memory_space<semaphore_mem>>) src(%9 : memref<1x32xf32, #tpu.memory_space<any>>) dst(%10 : memref<1x32xf32, #tpu.memory_space<vmem>>)
    }
    %c128_i32_5 = arith.constant 128 : i32
    %c0 = arith.constant 0 : index
    %c0_6 = arith.constant 0 : index
    %3 = vector.load %arg4[%c0, %c0_6] : memref<128x32xf32, #tpu.memory_space<vmem>>, vector<128x32xf32>
    %cst = arith.constant 5.65685415 : f32
    %4 = vector.broadcast %cst : f32 to vector<128x32xf32>
    %5 = arith.mulf %3, %4 : vector<128x32xf32>
    %c0_7 = arith.constant 0 : index
    %c0_8 = arith.constant 0 : index
    %6 = vector.load %arg3[%c0_7, %c0_8] : memref<128x32xf32, #tpu.memory_space<vmem>>, vector<128x32xf32>
    tpu.vector_store %arg3[%c0_7, %c0_8], %5 {strides = array<i32>} : memref<128x32xf32, #tpu.memory_space<vmem>>, vector<128x32xf32>,
    return
  }
  func.func @transform_1(%arg0: i32, %arg1: memref<128xi32, #tpu.memory_space<smem>>) -> (i32, i32) {
    %c0_i32 = arith.constant 0 : i32
    %c0_i32_0 = arith.constant 0 : i32
    return %arg0, %c0_i32 : i32, i32
  }
}

</mosaic_0001>

<bundles_post_ra>
// kernel: tpu_custom_call.1
= control target key start
LH: loop header
LB: loop body
LE: loop exit
PB: predicated region body
PF: predicated region fallthrough
CT: control target
= control target key end

     0   :  { %s1321_s0 = inlined_call_operand.hbm [shape: s32[128], index: 0, kind: input, shape index: {}]   ;;  %s1322_s1 = inlined_call_operand.hbm [shape: f32[32,32], index: 1, kind: input, shape index: {}]   ;;  %s1323_s2 = inlined_call_operand.vmem [shape: f32[128,32], index: 2, kind: output, shape index: {}]  }
   0x1   :  { %s1154_s11 = scalar_lea.hbm %s1321_s0, 16 }
   0x2   :  { %p1155_p0 = scmp.ne.s32.totalorder %s1321_s0, %s1154_s11  ;;  %p1158_p1 = scmp.lt.u32.totalorder %s1154_s11, %s1321_s0 }
   0x4   :  { %p1160_p2 = pnand %p1158_p1, %p1155_p0 }
   0x6   :  { %1163 = shalt.err (!%p1160_p2)  }
   0x7   :  { %s1208_s16 = smov [#allocation5]  }
   0x8   :  { %8 = dma.hbm_to_smem %s1321_s0, 16, %s1208_s16, [#allocation4] }
   0x9   :  { %1196 = dma.done.wait [#allocation4], 16 }
   0xa   :  { %1197 = vsyncadd [#allocation4], 4294967280 }
   0xb   :  { %10 = sfence }
   0xc   :  { %s1237_s19 = smov 0  }
   0xd LB: > { %s19_s20 = sld [smem:[#allocation5 + %s1202_s19]]  ;;  %s22_s21 = scalar_lea.vmem [#allocation2], %s1202_s19  ;;  %s1202_s19 = sphi %s1237_s19, %s17_s19  }
   0xe   : > { %s31_s22 = sshll.u32 %s22_s21, 4  ;;  %s23_s26 = scalar_lea.sflag [#allocation3], %s1202_s19  ;;  %s32_s22 = int_to_ptr.vmem [resolvable:$true] %s31_s22 }
   0xf   : > { %s1166_s30 = scalar_lea.hbm %s1322_s1, 512 }
  0x13   : > { %s1008_s23 = sshll.u32 %s19_s20, 4 }
  0x14   : > { %s21_s25 = scalar_lea.hbm %s1322_s1, %s1008_s23 }
  0x15   : > { %s1164_s27 = scalar_lea.hbm %s21_s25, 16  ;;  %p1167_p4 = scmp.lt.u32.totalorder %s21_s25, %s1322_s1 }
  0x16   : > { %p1165_p3 = scmp.ne.s32.totalorder %s21_s25, %s1164_s27  ;;  %p1168_p5 = scmp.lt.u32.totalorder %s1166_s30, %s1164_s27 }
  0x17   : > { %p1170_p7 = scmp.lt.u32.totalorder %s1164_s27, %s21_s25 }
  0x18   : > { %p1169_p6 = por %p1168_p5, %p1167_p4 }
  0x1a   : > { %p1171_p8 = por %p1170_p7, %p1169_p6 }
  0x1c   : > { %p1172_p9 = pnand %p1171_p8, %p1165_p3 }
  0x1e   : > { %1175 = shalt.err (!%p1172_p9)  }
  0x1f   : > { %s1176_s5 = scalar_lea.vmem %s32_s22, 16  ;;  %s1209_s6 = smov [#allocation2]  }
  0x20   : > { %p1177_p10 = scmp.ne.s32.totalorder %s32_s22, %s1176_s5  ;;  %s1178_s7 = sshll.u32 %s1209_s6, 4  ;;  %s1179_s7 = int_to_ptr.vmem [resolvable:$false] %s1178_s7 }
  0x21   : > { %s1180_s8 = scalar_lea.vmem %s1179_s7, 2048  ;;  %p1181_p11 = scmp.lt.s32.totalorder %s32_s22, %s1179_s7 }
  0x22   : > { %p1182_p12 = scmp.lt.s32.totalorder %s1180_s8, %s1176_s5 }
  0x24   : > { %p1183_p13 = por %p1182_p12, %p1181_p11 }
  0x26   : > { %p1184_p0 = pnand %p1183_p13, %p1177_p10 }
  0x28   : > { %1187 = shalt.err (!%p1184_p0)  }
  0x29   : > { %34 = dma.hbm_to_vmem [thread:$0]  %s21_s25, 16, %s32_s22, %s23_s26 }
  0x2a   : > { %s17_s19 = sadd.s32 1, %s1202_s19  }
  0x2b   : > { %p14_p1 = scmp.ge.s32.totalorder %s17_s19, 128  }
  0x2c   :  { %s1204_s9 = smov (%p14_p1), 0  }
  0x2d   :  { %16 = sbr.rel (!%p14_p1) target bundleno = 13 (0xd), region = 169 }
  0x34 LB: > { %s41_s10 = scalar_lea.sflag [#allocation3], %s1206_s9  ;;  %s1206_s9 = sphi %s1204_s9, %s40_s9  }
  0x35   : > { %1198 = dma.done.wait %s41_s10, 16 }
  0x36   : > { %1199 = vsyncadd %s41_s10, 4294967280  ;;  %s40_s9 = sadd.s32 1, %s1206_s9  }
  0x37   : > { %p37_p2 = scmp.ge.s32.totalorder %s40_s9, 128  }
  0x38   :  { %v45_v0 = vld [vmem:[#allocation2] sm:$0xff] (%p37_p2)  ;;  %vm77_vm0 = vcmask (%p37_p2), 261120   ;;  %v46_v1 = vld [vmem:[#allocation2 + $0x8] sm:$0xff] (%p37_p2)  ;;  %v47_v2 = vld [vmem:[#allocation2 + $0x10] sm:$0xff] (%p37_p2) }
  0x39   :  { %39 = sbr.rel (!%p37_p2) target bundleno = 52 (0x34), region = 180  ;;  %v61_v3 = vmul.f32 (%p37_p2), 5.656854, %v45_v0  ;;  %v62_v4 = vmul.f32 (%p37_p2), 5.656854, %v46_v1  ;;  %v48_v6 = vld [vmem:[#allocation2 + $0x18] sm:$0xff] (%p37_p2) }
  0x3a   :  { %v63_v5 = vmul.f32 (%p37_p2), 5.656854, %v47_v2  ;;  %v49_v7 = vld [vmem:[#allocation2 + $0x20] sm:$0xff] (%p37_p2)  ;;  %v50_v8 = vld [vmem:[#allocation2 + $0x28] sm:$0xff] (%p37_p2)  ;;  %v64_v9 = vmul.f32 (%p37_p2), 5.656854, %v48_v6 }
  0x3b   :  { %78 = vst.msk [vmem:[%s1323_s2] sm:$0xff] (%p37_p2), %vm77_vm0, %v61_v3  ;;  %79 = vst.msk [vmem:[%s1323_s2 + $0x8] sm:$0xff] (%p37_p2), %vm77_vm0, %v62_v4  ;;  %v65_v10 = vmul.f32 (%p37_p2), 5.656854, %v49_v7  ;;  %v66_v11 = vmul.f32 (%p37_p2), 5.656854, %v50_v8 }
  0x3c   :  { %80 = vst.msk [vmem:[%s1323_s2 + $0x10] sm:$0xff] (%p37_p2), %vm77_vm0, %v63_v5  ;;  %v51_v12 = vld [vmem:[#allocation2 + $0x30] sm:$0xff] (%p37_p2)  ;;  %v52_v13 = vld [vmem:[#allocation2 + $0x38] sm:$0xff] (%p37_p2)  ;;  %v53_v14 = vld [vmem:[#allocation2 + $0x40] sm:$0xff] (%p37_p2) }
  0x3d   :  { %81 = vst.msk [vmem:[%s1323_s2 + $0x18] sm:$0xff] (%p37_p2), %vm77_vm0, %v64_v9  ;;  %82 = vst.msk [vmem:[%s1323_s2 + $0x20] sm:$0xff] (%p37_p2), %vm77_vm0, %v65_v10  ;;  %v67_v15 = vmul.f32 (%p37_p2), 5.656854, %v51_v12  ;;  %v68_v16 = vmul.f32 (%p37_p2), 5.656854, %v52_v13 }
  0x3e   :  { %83 = vst.msk [vmem:[%s1323_s2 + $0x28] sm:$0xff] (%p37_p2), %vm77_vm0, %v66_v11  ;;  %v69_v17 = vmul.f32 (%p37_p2), 5.656854, %v53_v14  ;;  %v54_v18 = vld [vmem:[#allocation2 + $0x48] sm:$0xff] (%p37_p2)  ;;  %v55_v19 = vld [vmem:[#allocation2 + $0x50] sm:$0xff] (%p37_p2)  ;;  %v56_v20 = vld [vmem:[#allocation2 + $0x58] sm:$0xff] (%p37_p2) }
  0x3f   :  { %84 = vst.msk [vmem:[%s1323_s2 + $0x30] sm:$0xff] (%p37_p2), %vm77_vm0, %v67_v15  ;;  %85 = vst.msk [vmem:[%s1323_s2 + $0x38] sm:$0xff] (%p37_p2), %vm77_vm0, %v68_v16  ;;  %v70_v21 = vmul.f32 (%p37_p2), 5.656854, %v54_v18  ;;  %v71_v22 = vmul.f32 (%p37_p2), 5.656854, %v55_v19 }
  0x40   :  { %86 = vst.msk [vmem:[%s1323_s2 + $0x40] sm:$0xff] %vm77_vm0, %v69_v17  ;;  %v72_v23 = vmul.f32 5.656854, %v56_v20  ;;  %v57_v24 = vld [vmem:[#allocation2 + $0x60] sm:$0xff]  ;;  %v58_v25 = vld [vmem:[#allocation2 + $0x68] sm:$0xff]  ;;  %v59_v26 = vld [vmem:[#allocation2 + $0x70] sm:$0xff] }
  0x41   :  { %87 = vst.msk [vmem:[%s1323_s2 + $0x48] sm:$0xff] %vm77_vm0, %v70_v21  ;;  %88 = vst.msk [vmem:[%s1323_s2 + $0x50] sm:$0xff] %vm77_vm0, %v71_v22  ;;  %v73_v27 = vmul.f32 5.656854, %v57_v24  ;;  %v74_v28 = vmul.f32 5.656854, %v58_v25 }
  0x42   :  { %89 = vst.msk [vmem:[%s1323_s2 + $0x58] sm:$0xff] %vm77_vm0, %v72_v23  ;;  %v75_v29 = vmul.f32 5.656854, %v59_v26  ;;  %v60_v30 = vld [vmem:[#allocation2 + $0x78] sm:$0xff] }
  0x43   :  { %90 = vst.msk [vmem:[%s1323_s2 + $0x60] sm:$0xff] %vm77_vm0, %v73_v27  ;;  %91 = vst.msk [vmem:[%s1323_s2 + $0x68] sm:$0xff] %vm77_vm0, %v74_v28  ;;  %v76_v31 = vmul.f32 5.656854, %v60_v30 }
  0x44   :  { %92 = vst.msk [vmem:[%s1323_s2 + $0x70] sm:$0xff] %vm77_vm0, %v75_v29 }
  0x45   :  { %93 = vst.msk [vmem:[%s1323_s2 + $0x78] sm:$0xff] %vm77_vm0, %v76_v31 }
  0x46   :  { %98 = vsyncmov [#allocation3] }
  0x49   :  { %s99_s12 = vpop.sfrf %98 }
  0x4a   :  { %p1009_p3 = scmp.ne.s32.totalorder %s99_s12, 0 }
  0x4c   :  { %103 = shalt.err (%p1009_p3)  }
  0x4d   :  { %105 = vsyncmov [#allocation3 + $0x1] }
  0x50   :  { %s106_s13 = vpop.sfrf %105 }
  0x51   :  { %p1010_p4 = scmp.ne.s32.totalorder %s106_s13, 0 }
  0x53   :  { %110 = shalt.err (%p1010_p4)  }
  0x54   :  { %112 = vsyncmov [#allocation3 + $0x2] }
  0x57   :  { %s113_s14 = vpop.sfrf %112 }
  0x58   :  { %p1011_p5 = scmp.ne.s32.totalorder %s113_s14, 0 }
  0x5a   :  { %117 = shalt.err (%p1011_p5)  }
  0x5b   :  { %119 = vsyncmov [#allocation3 + $0x3] }
  0x5e   :  { %s120_s15 = vpop.sfrf %119 }
  0x5f   :  { %p1012_p6 = scmp.ne.s32.totalorder %s120_s15, 0 }
  0x61   :  { %124 = shalt.err (%p1012_p6)  }
  0x62   :  { %126 = vsyncmov [#allocation3 + $0x4] }
  0x65   :  { %s127_s16 = vpop.sfrf %126 }
  0x66   :  { %p1013_p7 = scmp.ne.s32.totalorder %s127_s16, 0 }
  0x68   :  { %131 = shalt.err (%p1013_p7)  }
  0x69   :  { %133 = vsyncmov [#allocation3 + $0x5] }
  0x6c   :  { %s134_s2 = vpop.sfrf %133 }
  0x6d   :  { %p1014_p8 = scmp.ne.s32.totalorder %s134_s2, 0 }
  0x6f   :  { %138 = shalt.err (%p1014_p8)  }
  0x70   :  { %140 = vsyncmov [#allocation3 + $0x6] }
  0x73   :  { %s141_s17 = vpop.sfrf %140 }
  0x74   :  { %p1015_p9 = scmp.ne.s32.totalorder %s141_s17, 0 }
  0x76   :  { %145 = shalt.err (%p1015_p9)  }
  0x77   :  { %147 = vsyncmov [#allocation3 + $0x7] }
  0x7a   :  { %s148_s18 = vpop.sfrf %147 }
  0x7b   :  { %p1016_p10 = scmp.ne.s32.totalorder %s148_s18, 0 }
  0x7d   :  { %152 = shalt.err (%p1016_p10)  }
  0x7e   :  { %154 = vsyncmov [#allocation3 + $0x8] }
  0x81   :  { %s155_s19 = vpop.sfrf %154 }
  0x82   :  { %p1017_p11 = scmp.ne.s32.totalorder %s155_s19, 0 }
  0x84   :  { %159 = shalt.err (%p1017_p11)  }
  0x85   :  { %161 = vsyncmov [#allocation3 + $0x9] }
  0x88   :  { %s162_s20 = vpop.sfrf %161 }
  0x89   :  { %p1018_p12 = scmp.ne.s32.totalorder %s162_s20, 0 }
  0x8b   :  { %166 = shalt.err (%p1018_p12)  }
  0x8c   :  { %168 = vsyncmov [#allocation3 + $0xa] }
  0x8f   :  { %s169_s21 = vpop.sfrf %168 }
  0x90   :  { %p1019_p13 = scmp.ne.s32.totalorder %s169_s21, 0 }
  0x92   :  { %173 = shalt.err (%p1019_p13)  }
  0x93   :  { %175 = vsyncmov [#allocation3 + $0xb] }
  0x96   :  { %s176_s22 = vpop.sfrf %175 }
  0x97   :  { %p1020_p0 = scmp.ne.s32.totalorder %s176_s22, 0 }
  0x99   :  { %180 = shalt.err (%p1020_p0)  }
  0x9a   :  { %182 = vsyncmov [#allocation3 + $0xc] }
  0x9d   :  { %s183_s23 = vpop.sfrf %182 }
  0x9e   :  { %p1021_p1 = scmp.ne.s32.totalorder %s183_s23, 0 }
  0xa0   :  { %187 = shalt.err (%p1021_p1)  }
  0xa1   :  { %189 = vsyncmov [#allocation3 + $0xd] }
  0xa4   :  { %s190_s24 = vpop.sfrf %189 }
  0xa5   :  { %p1022_p2 = scmp.ne.s32.totalorder %s190_s24, 0 }
  0xa7   :  { %194 = shalt.err (%p1022_p2)  }
  0xa8   :  { %196 = vsyncmov [#allocation3 + $0xe] }
  0xab   :  { %s197_s0 = vpop.sfrf %196 }
  0xac   :  { %p1023_p3 = scmp.ne.s32.totalorder %s197_s0, 0 }
  0xae   :  { %201 = shalt.err (%p1023_p3)  }
  0xaf   :  { %203 = vsyncmov [#allocation3 + $0xf] }
  0xb2   :  { %s204_s25 = vpop.sfrf %203 }
  0xb3   :  { %p1024_p4 = scmp.ne.s32.totalorder %s204_s25, 0 }
  0xb5   :  { %208 = shalt.err (%p1024_p4)  }
  0xb6   :  { %210 = vsyncmov [#allocation3 + $0x10] }
  0xb9   :  { %s211_s26 = vpop.sfrf %210 }
  0xba   :  { %p1025_p5 = scmp.ne.s32.totalorder %s211_s26, 0 }
  0xbc   :  { %215 = shalt.err (%p1025_p5)  }
  0xbd   :  { %217 = vsyncmov [#allocation3 + $0x11] }
  0xc0   :  { %s218_s27 = vpop.sfrf %217 }
  0xc1   :  { %p1026_p6 = scmp.ne.s32.totalorder %s218_s27, 0 }
  0xc3   :  { %222 = shalt.err (%p1026_p6)  }
  0xc4   :  { %224 = vsyncmov [#allocation3 + $0x12] }
  0xc7   :  { %s225_s28 = vpop.sfrf %224 }
  0xc8   :  { %p1027_p7 = scmp.ne.s32.totalorder %s225_s28, 0 }
  0xca   :  { %229 = shalt.err (%p1027_p7)  }
  0xcb   :  { %231 = vsyncmov [#allocation3 + $0x13] }
  0xce   :  { %s232_s29 = vpop.sfrf %231 }
  0xcf   :  { %p1028_p8 = scmp.ne.s32.totalorder %s232_s29, 0 }
  0xd1   :  { %236 = shalt.err (%p1028_p8)  }
  0xd2   :  { %238 = vsyncmov [#allocation3 + $0x14] }
  0xd5   :  { %s239_s30 = vpop.sfrf %238 }
  0xd6   :  { %p1029_p9 = scmp.ne.s32.totalorder %s239_s30, 0 }
  0xd8   :  { %243 = shalt.err (%p1029_p9)  }
  0xd9   :  { %245 = vsyncmov [#allocation3 + $0x15] }
  0xdc   :  { %s246_s3 = vpop.sfrf %245 }
  0xdd   :  { %p1030_p10 = scmp.ne.s32.totalorder %s246_s3, 0 }
  0xdf   :  { %250 = shalt.err (%p1030_p10)  }
  0xe0   :  { %252 = vsyncmov [#allocation3 + $0x16] }
  0xe3   :  { %s253_s4 = vpop.sfrf %252 }
  0xe4   :  { %p1031_p11 = scmp.ne.s32.totalorder %s253_s4, 0 }
  0xe6   :  { %257 = shalt.err (%p1031_p11)  }
  0xe7   :  { %259 = vsyncmov [#allocation3 + $0x17] }
  0xea   :  { %s260_s5 = vpop.sfrf %259 }
  0xeb   :  { %p1032_p12 = scmp.ne.s32.totalorder %s260_s5, 0 }
  0xed   :  { %264 = shalt.err (%p1032_p12)  }
  0xee   :  { %266 = vsyncmov [#allocation3 + $0x18] }
  0xf1   :  { %s267_s6 = vpop.sfrf %266 }
  0xf2   :  { %p1033_p13 = scmp.ne.s32.totalorder %s267_s6, 0 }
  0xf4   :  { %271 = shalt.err (%p1033_p13)  }
  0xf5   :  { %273 = vsyncmov [#allocation3 + $0x19] }
  0xf8   :  { %s274_s7 = vpop.sfrf %273 }
  0xf9   :  { %p1034_p0 = scmp.ne.s32.totalorder %s274_s7, 0 }
  0xfb   :  { %278 = shalt.err (%p1034_p0)  }
  0xfc   :  { %280 = vsyncmov [#allocation3 + $0x1a] }
  0xff   :  { %s281_s8 = vpop.sfrf %280 }
 0x100   :  { %p1035_p1 = scmp.ne.s32.totalorder %s281_s8, 0 }
 0x102   :  { %285 = shalt.err (%p1035_p1)  }
 0x103   :  { %287 = vsyncmov [#allocation3 + $0x1b] }
 0x106   :  { %s288_s9 = vpop.sfrf %287 }
 0x107   :  { %p1036_p2 = scmp.ne.s32.totalorder %s288_s9, 0 }
 0x109   :  { %292 = shalt.err (%p1036_p2)  }
 0x10a   :  { %294 = vsyncmov [#allocation3 + $0x1c] }
 0x10d   :  { %s295_s10 = vpop.sfrf %294 }
 0x10e   :  { %p1037_p3 = scmp.ne.s32.totalorder %s295_s10, 0 }
 0x110   :  { %299 = shalt.err (%p1037_p3)  }
 0x111   :  { %301 = vsyncmov [#allocation3 + $0x1d] }
 0x114   :  { %s302_s1 = vpop.sfrf %301 }
 0x115   :  { %p1038_p4 = scmp.ne.s32.totalorder %s302_s1, 0 }
 0x117   :  { %306 = shalt.err (%p1038_p4)  }
 0x118   :  { %308 = vsyncmov [#allocation3 + $0x1e] }
 0x11b   :  { %s309_s11 = vpop.sfrf %308 }
 0x11c   :  { %p1039_p5 = scmp.ne.s32.totalorder %s309_s11, 0 }
 0x11e   :  { %313 = shalt.err (%p1039_p5)  }
 0x11f   :  { %315 = vsyncmov [#allocation3 + $0x1f] }
 0x122   :  { %s316_s12 = vpop.sfrf %315 }
 0x123   :  { %p1040_p6 = scmp.ne.s32.totalorder %s316_s12, 0 }
 0x125   :  { %320 = shalt.err (%p1040_p6)  }
 0x126   :  { %322 = vsyncmov [#allocation3 + $0x20] }
 0x129   :  { %s323_s13 = vpop.sfrf %322 }
 0x12a   :  { %p1041_p7 = scmp.ne.s32.totalorder %s323_s13, 0 }
 0x12c   :  { %327 = shalt.err (%p1041_p7)  }
 0x12d   :  { %329 = vsyncmov [#allocation3 + $0x21] }
 0x130   :  { %s330_s14 = vpop.sfrf %329 }
 0x131   :  { %p1042_p8 = scmp.ne.s32.totalorder %s330_s14, 0 }
 0x133   :  { %334 = shalt.err (%p1042_p8)  }
 0x134   :  { %336 = vsyncmov [#allocation3 + $0x22] }
 0x137   :  { %s337_s15 = vpop.sfrf %336 }
 0x138   :  { %p1043_p9 = scmp.ne.s32.totalorder %s337_s15, 0 }
 0x13a   :  { %341 = shalt.err (%p1043_p9)  }
 0x13b   :  { %343 = vsyncmov [#allocation3 + $0x23] }
 0x13e   :  { %s344_s16 = vpop.sfrf %343 }
 0x13f   :  { %p1044_p10 = scmp.ne.s32.totalorder %s344_s16, 0 }
 0x141   :  { %348 = shalt.err (%p1044_p10)  }
 0x142   :  { %350 = vsyncmov [#allocation3 + $0x24] }
 0x145   :  { %s351_s2 = vpop.sfrf %350 }
 0x146   :  { %p1045_p11 = scmp.ne.s32.totalorder %s351_s2, 0 }
 0x148   :  { %355 = shalt.err (%p1045_p11)  }
 0x149   :  { %357 = vsyncmov [#allocation3 + $0x25] }
 0x14c   :  { %s358_s17 = vpop.sfrf %357 }
 0x14d   :  { %p1046_p12 = scmp.ne.s32.totalorder %s358_s17, 0 }
 0x14f   :  { %362 = shalt.err (%p1046_p12)  }
 0x150   :  { %364 = vsyncmov [#allocation3 + $0x26] }
 0x153   :  { %s365_s18 = vpop.sfrf %364 }
 0x154   :  { %p1047_p13 = scmp.ne.s32.totalorder %s365_s18, 0 }
 0x156   :  { %369 = shalt.err (%p1047_p13)  }
 0x157   :  { %371 = vsyncmov [#allocation3 + $0x27] }
 0x15a   :  { %s372_s19 = vpop.sfrf %371 }
 0x15b   :  { %p1048_p0 = scmp.ne.s32.totalorder %s372_s19, 0 }
 0x15d   :  { %376 = shalt.err (%p1048_p0)  }
 0x15e   :  { %378 = vsyncmov [#allocation3 + $0x28] }
 0x161   :  { %s379_s20 = vpop.sfrf %378 }
 0x162   :  { %p1049_p1 = scmp.ne.s32.totalorder %s379_s20, 0 }
 0x164   :  { %383 = shalt.err (%p1049_p1)  }
 0x165   :  { %385 = vsyncmov [#allocation3 + $0x29] }
 0x168   :  { %s386_s21 = vpop.sfrf %385 }
 0x169   :  { %p1050_p2 = scmp.ne.s32.totalorder %s386_s21, 0 }
 0x16b   :  { %390 = shalt.err (%p1050_p2)  }
 0x16c   :  { %392 = vsyncmov [#allocation3 + $0x2a] }
 0x16f   :  { %s393_s22 = vpop.sfrf %392 }
 0x170   :  { %p1051_p3 = scmp.ne.s32.totalorder %s393_s22, 0 }
 0x172   :  { %397 = shalt.err (%p1051_p3)  }
 0x173   :  { %399 = vsyncmov [#allocation3 + $0x2b] }
 0x176   :  { %s400_s23 = vpop.sfrf %399 }
 0x177   :  { %p1052_p4 = scmp.ne.s32.totalorder %s400_s23, 0 }
 0x179   :  { %404 = shalt.err (%p1052_p4)  }
 0x17a   :  { %406 = vsyncmov [#allocation3 + $0x2c] }
 0x17d   :  { %s407_s24 = vpop.sfrf %406 }
 0x17e   :  { %p1053_p5 = scmp.ne.s32.totalorder %s407_s24, 0 }
 0x180   :  { %411 = shalt.err (%p1053_p5)  }
 0x181   :  { %413 = vsyncmov [#allocation3 + $0x2d] }
 0x184   :  { %s414_s0 = vpop.sfrf %413 }
 0x185   :  { %p1054_p6 = scmp.ne.s32.totalorder %s414_s0, 0 }
 0x187   :  { %418 = shalt.err (%p1054_p6)  }
 0x188   :  { %420 = vsyncmov [#allocation3 + $0x2e] }
 0x18b   :  { %s421_s25 = vpop.sfrf %420 }
 0x18c   :  { %p1055_p7 = scmp.ne.s32.totalorder %s421_s25, 0 }
 0x18e   :  { %425 = shalt.err (%p1055_p7)  }
 0x18f   :  { %427 = vsyncmov [#allocation3 + $0x2f] }
 0x192   :  { %s428_s26 = vpop.sfrf %427 }
 0x193   :  { %p1056_p8 = scmp.ne.s32.totalorder %s428_s26, 0 }
 0x195   :  { %432 = shalt.err (%p1056_p8)  }
 0x196   :  { %434 = vsyncmov [#allocation3 + $0x30] }
 0x199   :  { %s435_s27 = vpop.sfrf %434 }
 0x19a   :  { %p1057_p9 = scmp.ne.s32.totalorder %s435_s27, 0 }
 0x19c   :  { %439 = shalt.err (%p1057_p9)  }
 0x19d   :  { %441 = vsyncmov [#allocation3 + $0x31] }
 0x1a0   :  { %s442_s28 = vpop.sfrf %441 }
 0x1a1   :  { %p1058_p10 = scmp.ne.s32.totalorder %s442_s28, 0 }
 0x1a3   :  { %446 = shalt.err (%p1058_p10)  }
 0x1a4   :  { %448 = vsyncmov [#allocation3 + $0x32] }
 0x1a7   :  { %s449_s29 = vpop.sfrf %448 }
 0x1a8   :  { %p1059_p11 = scmp.ne.s32.totalorder %s449_s29, 0 }
 0x1aa   :  { %453 = shalt.err (%p1059_p11)  }
 0x1ab   :  { %455 = vsyncmov [#allocation3 + $0x33] }
 0x1ae   :  { %s456_s30 = vpop.sfrf %455 }
 0x1af   :  { %p1060_p12 = scmp.ne.s32.totalorder %s456_s30, 0 }
 0x1b1   :  { %460 = shalt.err (%p1060_p12)  }
 0x1b2   :  { %462 = vsyncmov [#allocation3 + $0x34] }
 0x1b5   :  { %s463_s3 = vpop.sfrf %462 }
 0x1b6   :  { %p1061_p13 = scmp.ne.s32.totalorder %s463_s3, 0 }
 0x1b8   :  { %467 = shalt.err (%p1061_p13)  }
 0x1b9   :  { %469 = vsyncmov [#allocation3 + $0x35] }
 0x1bc   :  { %s470_s4 = vpop.sfrf %469 }
 0x1bd   :  { %p1062_p0 = scmp.ne.s32.totalorder %s470_s4, 0 }
 0x1bf   :  { %474 = shalt.err (%p1062_p0)  }
 0x1c0   :  { %476 = vsyncmov [#allocation3 + $0x36] }
 0x1c3   :  { %s477_s5 = vpop.sfrf %476 }
 0x1c4   :  { %p1063_p1 = scmp.ne.s32.totalorder %s477_s5, 0 }
 0x1c6   :  { %481 = shalt.err (%p1063_p1)  }
 0x1c7   :  { %483 = vsyncmov [#allocation3 + $0x37] }
 0x1ca   :  { %s484_s6 = vpop.sfrf %483 }
 0x1cb   :  { %p1064_p2 = scmp.ne.s32.totalorder %s484_s6, 0 }
 0x1cd   :  { %488 = shalt.err (%p1064_p2)  }
 0x1ce   :  { %490 = vsyncmov [#allocation3 + $0x38] }
 0x1d1   :  { %s491_s7 = vpop.sfrf %490 }
 0x1d2   :  { %p1065_p3 = scmp.ne.s32.totalorder %s491_s7, 0 }
 0x1d4   :  { %495 = shalt.err (%p1065_p3)  }
 0x1d5   :  { %497 = vsyncmov [#allocation3 + $0x39] }
 0x1d8   :  { %s498_s8 = vpop.sfrf %497 }
 0x1d9   :  { %p1066_p4 = scmp.ne.s32.totalorder %s498_s8, 0 }
 0x1db   :  { %502 = shalt.err (%p1066_p4)  }
 0x1dc   :  { %504 = vsyncmov [#allocation3 + $0x3a] }
 0x1df   :  { %s505_s9 = vpop.sfrf %504 }
 0x1e0   :  { %p1067_p5 = scmp.ne.s32.totalorder %s505_s9, 0 }
 0x1e2   :  { %509 = shalt.err (%p1067_p5)  }
 0x1e3   :  { %511 = vsyncmov [#allocation3 + $0x3b] }
 0x1e6   :  { %s512_s10 = vpop.sfrf %511 }
 0x1e7   :  { %p1068_p6 = scmp.ne.s32.totalorder %s512_s10, 0 }
 0x1e9   :  { %516 = shalt.err (%p1068_p6)  }
 0x1ea   :  { %518 = vsyncmov [#allocation3 + $0x3c] }
 0x1ed   :  { %s519_s1 = vpop.sfrf %518 }
 0x1ee   :  { %p1069_p7 = scmp.ne.s32.totalorder %s519_s1, 0 }
 0x1f0   :  { %523 = shalt.err (%p1069_p7)  }
 0x1f1   :  { %525 = vsyncmov [#allocation3 + $0x3d] }
 0x1f4   :  { %s526_s11 = vpop.sfrf %525 }
 0x1f5   :  { %p1070_p8 = scmp.ne.s32.totalorder %s526_s11, 0 }
 0x1f7   :  { %530 = shalt.err (%p1070_p8)  }
 0x1f8   :  { %532 = vsyncmov [#allocation3 + $0x3e] }
 0x1fb   :  { %s533_s12 = vpop.sfrf %532 }
 0x1fc   :  { %p1071_p9 = scmp.ne.s32.totalorder %s533_s12, 0 }
 0x1fe   :  { %537 = shalt.err (%p1071_p9)  }
 0x1ff   :  { %539 = vsyncmov [#allocation3 + $0x3f] }
 0x202   :  { %s540_s13 = vpop.sfrf %539 }
 0x203   :  { %p1072_p10 = scmp.ne.s32.totalorder %s540_s13, 0 }
 0x205   :  { %544 = shalt.err (%p1072_p10)  }
 0x206   :  { %546 = vsyncmov [#allocation3 + $0x40] }
 0x209   :  { %s547_s14 = vpop.sfrf %546 }
 0x20a   :  { %p1073_p11 = scmp.ne.s32.totalorder %s547_s14, 0 }
 0x20c   :  { %551 = shalt.err (%p1073_p11)  }
 0x20d   :  { %553 = vsyncmov [#allocation3 + $0x41] }
 0x210   :  { %s554_s15 = vpop.sfrf %553 }
 0x211   :  { %p1074_p12 = scmp.ne.s32.totalorder %s554_s15, 0 }
 0x213   :  { %558 = shalt.err (%p1074_p12)  }
 0x214   :  { %560 = vsyncmov [#allocation3 + $0x42] }
 0x217   :  { %s561_s16 = vpop.sfrf %560 }
 0x218   :  { %p1075_p13 = scmp.ne.s32.totalorder %s561_s16, 0 }
 0x21a   :  { %565 = shalt.err (%p1075_p13)  }
 0x21b   :  { %567 = vsyncmov [#allocation3 + $0x43] }
 0x21e   :  { %s568_s2 = vpop.sfrf %567 }
 0x21f   :  { %p1076_p0 = scmp.ne.s32.totalorder %s568_s2, 0 }
 0x221   :  { %572 = shalt.err (%p1076_p0)  }
 0x222   :  { %574 = vsyncmov [#allocation3 + $0x44] }
 0x225   :  { %s575_s17 = vpop.sfrf %574 }
 0x226   :  { %p1077_p1 = scmp.ne.s32.totalorder %s575_s17, 0 }
 0x228   :  { %579 = shalt.err (%p1077_p1)  }
 0x229   :  { %581 = vsyncmov [#allocation3 + $0x45] }
 0x22c   :  { %s582_s18 = vpop.sfrf %581 }
 0x22d   :  { %p1078_p2 = scmp.ne.s32.totalorder %s582_s18, 0 }
 0x22f   :  { %586 = shalt.err (%p1078_p2)  }
 0x230   :  { %588 = vsyncmov [#allocation3 + $0x46] }
 0x233   :  { %s589_s19 = vpop.sfrf %588 }
 0x234   :  { %p1079_p3 = scmp.ne.s32.totalorder %s589_s19, 0 }
 0x236   :  { %593 = shalt.err (%p1079_p3)  }
 0x237   :  { %595 = vsyncmov [#allocation3 + $0x47] }
 0x23a   :  { %s596_s20 = vpop.sfrf %595 }
 0x23b   :  { %p1080_p4 = scmp.ne.s32.totalorder %s596_s20, 0 }
 0x23d   :  { %600 = shalt.err (%p1080_p4)  }
 0x23e   :  { %602 = vsyncmov [#allocation3 + $0x48] }
 0x241   :  { %s603_s21 = vpop.sfrf %602 }
 0x242   :  { %p1081_p5 = scmp.ne.s32.totalorder %s603_s21, 0 }
 0x244   :  { %607 = shalt.err (%p1081_p5)  }
 0x245   :  { %609 = vsyncmov [#allocation3 + $0x49] }
 0x248   :  { %s610_s22 = vpop.sfrf %609 }
 0x249   :  { %p1082_p6 = scmp.ne.s32.totalorder %s610_s22, 0 }
 0x24b   :  { %614 = shalt.err (%p1082_p6)  }
 0x24c   :  { %616 = vsyncmov [#allocation3 + $0x4a] }
 0x24f   :  { %s617_s23 = vpop.sfrf %616 }
 0x250   :  { %p1083_p7 = scmp.ne.s32.totalorder %s617_s23, 0 }
 0x252   :  { %621 = shalt.err (%p1083_p7)  }
 0x253   :  { %623 = vsyncmov [#allocation3 + $0x4b] }
 0x256   :  { %s624_s24 = vpop.sfrf %623 }
 0x257   :  { %p1084_p8 = scmp.ne.s32.totalorder %s624_s24, 0 }
 0x259   :  { %628 = shalt.err (%p1084_p8)  }
 0x25a   :  { %630 = vsyncmov [#allocation3 + $0x4c] }
 0x25d   :  { %s631_s0 = vpop.sfrf %630 }
 0x25e   :  { %p1085_p9 = scmp.ne.s32.totalorder %s631_s0, 0 }
 0x260   :  { %635 = shalt.err (%p1085_p9)  }
 0x261   :  { %637 = vsyncmov [#allocation3 + $0x4d] }
 0x264   :  { %s638_s25 = vpop.sfrf %637 }
 0x265   :  { %p1086_p10 = scmp.ne.s32.totalorder %s638_s25, 0 }
 0x267   :  { %642 = shalt.err (%p1086_p10)  }
 0x268   :  { %644 = vsyncmov [#allocation3 + $0x4e] }
 0x26b   :  { %s645_s26 = vpop.sfrf %644 }
 0x26c   :  { %p1087_p11 = scmp.ne.s32.totalorder %s645_s26, 0 }
 0x26e   :  { %649 = shalt.err (%p1087_p11)  }
 0x26f   :  { %651 = vsyncmov [#allocation3 + $0x4f] }
 0x272   :  { %s652_s27 = vpop.sfrf %651 }
 0x273   :  { %p1088_p12 = scmp.ne.s32.totalorder %s652_s27, 0 }
 0x275   :  { %656 = shalt.err (%p1088_p12)  }
 0x276   :  { %658 = vsyncmov [#allocation3 + $0x50] }
 0x279   :  { %s659_s28 = vpop.sfrf %658 }
 0x27a   :  { %p1089_p13 = scmp.ne.s32.totalorder %s659_s28, 0 }
 0x27c   :  { %663 = shalt.err (%p1089_p13)  }
 0x27d   :  { %665 = vsyncmov [#allocation3 + $0x51] }
 0x280   :  { %s666_s29 = vpop.sfrf %665 }
 0x281   :  { %p1090_p0 = scmp.ne.s32.totalorder %s666_s29, 0 }
 0x283   :  { %670 = shalt.err (%p1090_p0)  }
 0x284   :  { %672 = vsyncmov [#allocation3 + $0x52] }
 0x287   :  { %s673_s30 = vpop.sfrf %672 }
 0x288   :  { %p1091_p1 = scmp.ne.s32.totalorder %s673_s30, 0 }
 0x28a   :  { %677 = shalt.err (%p1091_p1)  }
 0x28b   :  { %679 = vsyncmov [#allocation3 + $0x53] }
 0x28e   :  { %s680_s3 = vpop.sfrf %679 }
 0x28f   :  { %p1092_p2 = scmp.ne.s32.totalorder %s680_s3, 0 }
 0x291   :  { %684 = shalt.err (%p1092_p2)  }
 0x292   :  { %686 = vsyncmov [#allocation3 + $0x54] }
 0x295   :  { %s687_s4 = vpop.sfrf %686 }
 0x296   :  { %p1093_p3 = scmp.ne.s32.totalorder %s687_s4, 0 }
 0x298   :  { %691 = shalt.err (%p1093_p3)  }
 0x299   :  { %693 = vsyncmov [#allocation3 + $0x55] }
 0x29c   :  { %s694_s5 = vpop.sfrf %693 }
 0x29d   :  { %p1094_p4 = scmp.ne.s32.totalorder %s694_s5, 0 }
 0x29f   :  { %698 = shalt.err (%p1094_p4)  }
 0x2a0   :  { %700 = vsyncmov [#allocation3 + $0x56] }
 0x2a3   :  { %s701_s6 = vpop.sfrf %700 }
 0x2a4   :  { %p1095_p5 = scmp.ne.s32.totalorder %s701_s6, 0 }
 0x2a6   :  { %705 = shalt.err (%p1095_p5)  }
 0x2a7   :  { %707 = vsyncmov [#allocation3 + $0x57] }
 0x2aa   :  { %s708_s7 = vpop.sfrf %707 }
 0x2ab   :  { %p1096_p6 = scmp.ne.s32.totalorder %s708_s7, 0 }
 0x2ad   :  { %712 = shalt.err (%p1096_p6)  }
 0x2ae   :  { %714 = vsyncmov [#allocation3 + $0x58] }
 0x2b1   :  { %s715_s8 = vpop.sfrf %714 }
 0x2b2   :  { %p1097_p7 = scmp.ne.s32.totalorder %s715_s8, 0 }
 0x2b4   :  { %719 = shalt.err (%p1097_p7)  }
 0x2b5   :  { %721 = vsyncmov [#allocation3 + $0x59] }
 0x2b8   :  { %s722_s9 = vpop.sfrf %721 }
 0x2b9   :  { %p1098_p8 = scmp.ne.s32.totalorder %s722_s9, 0 }
 0x2bb   :  { %726 = shalt.err (%p1098_p8)  }
 0x2bc   :  { %728 = vsyncmov [#allocation3 + $0x5a] }
 0x2bf   :  { %s729_s10 = vpop.sfrf %728 }
 0x2c0   :  { %p1099_p9 = scmp.ne.s32.totalorder %s729_s10, 0 }
 0x2c2   :  { %733 = shalt.err (%p1099_p9)  }
 0x2c3   :  { %735 = vsyncmov [#allocation3 + $0x5b] }
 0x2c6   :  { %s736_s1 = vpop.sfrf %735 }
 0x2c7   :  { %p1100_p10 = scmp.ne.s32.totalorder %s736_s1, 0 }
 0x2c9   :  { %740 = shalt.err (%p1100_p10)  }
 0x2ca   :  { %742 = vsyncmov [#allocation3 + $0x5c] }
 0x2cd   :  { %s743_s11 = vpop.sfrf %742 }
 0x2ce   :  { %p1101_p11 = scmp.ne.s32.totalorder %s743_s11, 0 }
 0x2d0   :  { %747 = shalt.err (%p1101_p11)  }
 0x2d1   :  { %749 = vsyncmov [#allocation3 + $0x5d] }
 0x2d4   :  { %s750_s12 = vpop.sfrf %749 }
 0x2d5   :  { %p1102_p12 = scmp.ne.s32.totalorder %s750_s12, 0 }
 0x2d7   :  { %754 = shalt.err (%p1102_p12)  }
 0x2d8   :  { %756 = vsyncmov [#allocation3 + $0x5e] }
 0x2db   :  { %s757_s13 = vpop.sfrf %756 }
 0x2dc   :  { %p1103_p13 = scmp.ne.s32.totalorder %s757_s13, 0 }
 0x2de   :  { %761 = shalt.err (%p1103_p13)  }
 0x2df   :  { %763 = vsyncmov [#allocation3 + $0x5f] }
 0x2e2   :  { %s764_s14 = vpop.sfrf %763 }
 0x2e3   :  { %p1104_p0 = scmp.ne.s32.totalorder %s764_s14, 0 }
 0x2e5   :  { %768 = shalt.err (%p1104_p0)  }
 0x2e6   :  { %770 = vsyncmov [#allocation3 + $0x60] }
 0x2e9   :  { %s771_s15 = vpop.sfrf %770 }
 0x2ea   :  { %p1105_p1 = scmp.ne.s32.totalorder %s771_s15, 0 }
 0x2ec   :  { %775 = shalt.err (%p1105_p1)  }
 0x2ed   :  { %777 = vsyncmov [#allocation3 + $0x61] }
 0x2f0   :  { %s778_s16 = vpop.sfrf %777 }
 0x2f1   :  { %p1106_p2 = scmp.ne.s32.totalorder %s778_s16, 0 }
 0x2f3   :  { %782 = shalt.err (%p1106_p2)  }
 0x2f4   :  { %784 = vsyncmov [#allocation3 + $0x62] }
 0x2f7   :  { %s785_s2 = vpop.sfrf %784 }
 0x2f8   :  { %p1107_p3 = scmp.ne.s32.totalorder %s785_s2, 0 }
 0x2fa   :  { %789 = shalt.err (%p1107_p3)  }
 0x2fb   :  { %791 = vsyncmov [#allocation3 + $0x63] }
 0x2fe   :  { %s792_s17 = vpop.sfrf %791 }
 0x2ff   :  { %p1108_p4 = scmp.ne.s32.totalorder %s792_s17, 0 }
 0x301   :  { %796 = shalt.err (%p1108_p4)  }
 0x302   :  { %798 = vsyncmov [#allocation3 + $0x64] }
 0x305   :  { %s799_s18 = vpop.sfrf %798 }
 0x306   :  { %p1109_p5 = scmp.ne.s32.totalorder %s799_s18, 0 }
 0x308   :  { %803 = shalt.err (%p1109_p5)  }
 0x309   :  { %805 = vsyncmov [#allocation3 + $0x65] }
 0x30c   :  { %s806_s19 = vpop.sfrf %805 }
 0x30d   :  { %p1110_p6 = scmp.ne.s32.totalorder %s806_s19, 0 }
 0x30f   :  { %810 = shalt.err (%p1110_p6)  }
 0x310   :  { %812 = vsyncmov [#allocation3 + $0x66] }
 0x313   :  { %s813_s20 = vpop.sfrf %812 }
 0x314   :  { %p1111_p7 = scmp.ne.s32.totalorder %s813_s20, 0 }
 0x316   :  { %817 = shalt.err (%p1111_p7)  }
 0x317   :  { %819 = vsyncmov [#allocation3 + $0x67] }
 0x31a   :  { %s820_s21 = vpop.sfrf %819 }
 0x31b   :  { %p1112_p8 = scmp.ne.s32.totalorder %s820_s21, 0 }
 0x31d   :  { %824 = shalt.err (%p1112_p8)  }
 0x31e   :  { %826 = vsyncmov [#allocation3 + $0x68] }
 0x321   :  { %s827_s22 = vpop.sfrf %826 }
 0x322   :  { %p1113_p9 = scmp.ne.s32.totalorder %s827_s22, 0 }
 0x324   :  { %831 = shalt.err (%p1113_p9)  }
 0x325   :  { %833 = vsyncmov [#allocation3 + $0x69] }
 0x328   :  { %s834_s23 = vpop.sfrf %833 }
 0x329   :  { %p1114_p10 = scmp.ne.s32.totalorder %s834_s23, 0 }
 0x32b   :  { %838 = shalt.err (%p1114_p10)  }
 0x32c   :  { %840 = vsyncmov [#allocation3 + $0x6a] }
 0x32f   :  { %s841_s24 = vpop.sfrf %840 }
 0x330   :  { %p1115_p11 = scmp.ne.s32.totalorder %s841_s24, 0 }
 0x332   :  { %845 = shalt.err (%p1115_p11)  }
 0x333   :  { %847 = vsyncmov [#allocation3 + $0x6b] }
 0x336   :  { %s848_s0 = vpop.sfrf %847 }
 0x337   :  { %p1116_p12 = scmp.ne.s32.totalorder %s848_s0, 0 }
 0x339   :  { %852 = shalt.err (%p1116_p12)  }
 0x33a   :  { %854 = vsyncmov [#allocation3 + $0x6c] }
 0x33d   :  { %s855_s25 = vpop.sfrf %854 }
 0x33e   :  { %p1117_p13 = scmp.ne.s32.totalorder %s855_s25, 0 }
 0x340   :  { %859 = shalt.err (%p1117_p13)  }
 0x341   :  { %861 = vsyncmov [#allocation3 + $0x6d] }
 0x344   :  { %s862_s26 = vpop.sfrf %861 }
 0x345   :  { %p1118_p0 = scmp.ne.s32.totalorder %s862_s26, 0 }
 0x347   :  { %866 = shalt.err (%p1118_p0)  }
 0x348   :  { %868 = vsyncmov [#allocation3 + $0x6e] }
 0x34b   :  { %s869_s27 = vpop.sfrf %868 }
 0x34c   :  { %p1119_p1 = scmp.ne.s32.totalorder %s869_s27, 0 }
 0x34e   :  { %873 = shalt.err (%p1119_p1)  }
 0x34f   :  { %875 = vsyncmov [#allocation3 + $0x6f] }
 0x352   :  { %s876_s28 = vpop.sfrf %875 }
 0x353   :  { %p1120_p2 = scmp.ne.s32.totalorder %s876_s28, 0 }
 0x355   :  { %880 = shalt.err (%p1120_p2)  }
 0x356   :  { %882 = vsyncmov [#allocation3 + $0x70] }
 0x359   :  { %s883_s29 = vpop.sfrf %882 }
 0x35a   :  { %p1121_p3 = scmp.ne.s32.totalorder %s883_s29, 0 }
 0x35c   :  { %887 = shalt.err (%p1121_p3)  }
 0x35d   :  { %889 = vsyncmov [#allocation3 + $0x71] }
 0x360   :  { %s890_s30 = vpop.sfrf %889 }
 0x361   :  { %p1122_p4 = scmp.ne.s32.totalorder %s890_s30, 0 }
 0x363   :  { %894 = shalt.err (%p1122_p4)  }
 0x364   :  { %896 = vsyncmov [#allocation3 + $0x72] }
 0x367   :  { %s897_s3 = vpop.sfrf %896 }
 0x368   :  { %p1123_p5 = scmp.ne.s32.totalorder %s897_s3, 0 }
 0x36a   :  { %901 = shalt.err (%p1123_p5)  }
 0x36b   :  { %903 = vsyncmov [#allocation3 + $0x73] }
 0x36e   :  { %s904_s4 = vpop.sfrf %903 }
 0x36f   :  { %p1124_p6 = scmp.ne.s32.totalorder %s904_s4, 0 }
 0x371   :  { %908 = shalt.err (%p1124_p6)  }
 0x372   :  { %910 = vsyncmov [#allocation3 + $0x74] }
 0x375   :  { %s911_s5 = vpop.sfrf %910 }
 0x376   :  { %p1125_p7 = scmp.ne.s32.totalorder %s911_s5, 0 }
 0x378   :  { %915 = shalt.err (%p1125_p7)  }
 0x379   :  { %917 = vsyncmov [#allocation3 + $0x75] }
 0x37c   :  { %s918_s6 = vpop.sfrf %917 }
 0x37d   :  { %p1126_p8 = scmp.ne.s32.totalorder %s918_s6, 0 }
 0x37f   :  { %922 = shalt.err (%p1126_p8)  }
 0x380   :  { %924 = vsyncmov [#allocation3 + $0x76] }
 0x383   :  { %s925_s7 = vpop.sfrf %924 }
 0x384   :  { %p1127_p9 = scmp.ne.s32.totalorder %s925_s7, 0 }
 0x386   :  { %929 = shalt.err (%p1127_p9)  }
 0x387   :  { %931 = vsyncmov [#allocation3 + $0x77] }
 0x38a   :  { %s932_s8 = vpop.sfrf %931 }
 0x38b   :  { %p1128_p10 = scmp.ne.s32.totalorder %s932_s8, 0 }
 0x38d   :  { %936 = shalt.err (%p1128_p10)  }
 0x38e   :  { %938 = vsyncmov [#allocation3 + $0x78] }
 0x391   :  { %s939_s9 = vpop.sfrf %938 }
 0x392   :  { %p1129_p11 = scmp.ne.s32.totalorder %s939_s9, 0 }
 0x394   :  { %943 = shalt.err (%p1129_p11)  }
 0x395   :  { %945 = vsyncmov [#allocation3 + $0x79] }
 0x398   :  { %s946_s10 = vpop.sfrf %945 }
 0x399   :  { %p1130_p12 = scmp.ne.s32.totalorder %s946_s10, 0 }
 0x39b   :  { %950 = shalt.err (%p1130_p12)  }
 0x39c   :  { %952 = vsyncmov [#allocation3 + $0x7a] }
 0x39f   :  { %s953_s1 = vpop.sfrf %952 }
 0x3a0   :  { %p1131_p13 = scmp.ne.s32.totalorder %s953_s1, 0 }
 0x3a2   :  { %957 = shalt.err (%p1131_p13)  }
 0x3a3   :  { %959 = vsyncmov [#allocation3 + $0x7b] }
 0x3a6   :  { %s960_s11 = vpop.sfrf %959 }
 0x3a7   :  { %p1132_p0 = scmp.ne.s32.totalorder %s960_s11, 0 }
 0x3a9   :  { %964 = shalt.err (%p1132_p0)  }
 0x3aa   :  { %966 = vsyncmov [#allocation3 + $0x7c] }
 0x3ad   :  { %s967_s12 = vpop.sfrf %966 }
 0x3ae   :  { %p1133_p1 = scmp.ne.s32.totalorder %s967_s12, 0 }
 0x3b0   :  { %971 = shalt.err (%p1133_p1)  }
 0x3b1   :  { %973 = vsyncmov [#allocation3 + $0x7d] }
 0x3b4   :  { %s974_s13 = vpop.sfrf %973 }
 0x3b5   :  { %p1134_p2 = scmp.ne.s32.totalorder %s974_s13, 0 }
 0x3b7   :  { %978 = shalt.err (%p1134_p2)  }
 0x3b8   :  { %980 = vsyncmov [#allocation3 + $0x7e] }
 0x3bb   :  { %s981_s14 = vpop.sfrf %980 }
 0x3bc   :  { %p1135_p3 = scmp.ne.s32.totalorder %s981_s14, 0 }
 0x3be   :  { %985 = shalt.err (%p1135_p3)  }
 0x3bf   :  { %987 = vsyncmov [#allocation3 + $0x7f] }
 0x3c2   :  { %s988_s15 = vpop.sfrf %987 }
 0x3c3   :  { %p1136_p4 = scmp.ne.s32.totalorder %s988_s15, 0 }
 0x3c5   :  { %992 = shalt.err (%p1136_p4)  }

</bundles_post_ra>
